<compile_context>
chip_gen: v7x
topology: tpu7x:2x2x1
jax: 0.10.0
libtpu: 0.0.40
codegen_flags: <defaults>
</compile_context>

<pallas_src>
import functools

import jax
import jax.numpy as jnp
from jax import lax
from jax.experimental import pallas as pl
from jax.experimental.pallas import tpu as pltpu

EPS = 1e-5            # PyTorch BatchNorm1d default eps
NEG_SLOPE = 0.2       # LeakyReLU(0.2)
MAX_TIME_TILE = 512   # multiple of 128 -> fine on v5e (4x128 MXU) and v6e/v7x (256x256)


# ---------------------------------------------------------------------------
# Fused kernel: ReflectionPad1d (pre-padded) + Conv1d(stride=2) + bias + LeakyReLU
# for one (batch, output-time-tile) grid point.
# ---------------------------------------------------------------------------
def _conv_layer_kernel(xe_ref, xo_ref, w_ref, b_ref, o_ref, *, K, TT, nTT):
    """
    xe_ref: (1, Cin, L)    bf16  even time samples of the reflect-padded input
    xo_ref: (1, Cin, L)    bf16  odd  time samples
    w_ref : (K, Cout, Cin) bf16  conv weight, tap-major
    b_ref : (Cout, 1)      f32   bias
    o_ref : (1, Cout, TT)        output tile (time on the lane axis -> dense stores)
    """
    cout = o_ref.shape[1]

    if nTT == 1:
        t0 = 0                                              # static slice starts
    else:
        t0 = pl.multiple_of(pl.program_id(1) * TT, TT)      # 128-aligned tile origin

    # out[:, t] = sum_k W[:, :, k] @ xp[:, 2t + k]
    #   k even -> even stream at (t + k//2), k odd -> odd stream at (t + k//2)
    acc = jnp.zeros((cout, TT), jnp.float32)
    for k in range(K):                                      # K is static -> unrolled
        src = xe_ref if k % 2 == 0 else xo_ref
        xk = src[0, :, pl.ds(t0 + (k // 2), TT)]            # (Cin, TT) bf16, contiguous
        acc += jnp.dot(w_ref[k], xk, preferred_element_type=jnp.float32)  # MXU, f32 acc

    acc = acc + b_ref[...]                                  # (Cout,1) bcast over lanes
    y = jnp.where(acc >= 0, acc, NEG_SLOPE * acc)           # LeakyReLU(0.2), f32 VPU
    o_ref[0] = y.astype(o_ref.dtype)


def _choose_time_tile(t_out):
    if t_out <= MAX_TIME_TILE:
        return t_out, 1          # single full-extent tile (exempt from the /128 rule)
    return MAX_TIME_TILE, pl.cdiv(t_out, MAX_TIME_TILE)


def conv1d_reflect_leaky(x, w, b, *, pad, out_dtype):
    """x: (N, Cin, T) bf16;  w: (Cout, Cin, K) f32;  b: (Cout,) f32 -> (N, Cout, Tout)."""
    N, Cin, T = x.shape
    Cout, Cin2, K = w.shape
    assert Cin2 == Cin
    Tp = T + 2 * pad
    Tout = (Tp - K) // 2 + 1
    TT, nTT = _choose_time_tile(Tout)
    L = nTT * TT + (K - 1) // 2        # stream length incl. stride-2 halo + tile roundup

    # Reflection pad + even/odd phase split + zero round-up: pure layout plumbing,
    # XLA fuses it into ~one pass over x (no K*Cin im2col materialization).
    xp = jnp.pad(x, ((0, 0), (0, 0), (pad, pad)), mode="reflect")
    xe = xp[:, :, 0::2]
    xo = xp[:, :, 1::2]
    xe = jnp.pad(xe, ((0, 0), (0, 0), (0, L - xe.shape[2])))
    xo = jnp.pad(xo, ((0, 0), (0, 0), (0, L - xo.shape[2])))

    wk = jnp.transpose(w, (2, 0, 1)).astype(jnp.bfloat16)   # (K, Cout, Cin) bf16
    b2 = b.astype(jnp.float32).reshape(Cout, 1)

    # Explicit VMEM budget (double-buffered) so this also fits v7x's 64 MiB physical
    # VMEM; v5e/v6e have 128 MiB.
    est = (2 * 2 * Cin * L * xe.dtype.itemsize             # 2 resident streams, 2 bufs
           + 2 * (K * Cout * Cin * 2 + Cout * 4)           # weights + bias
           + 2 * Cout * TT * jnp.dtype(out_dtype).itemsize)  # output tile, 2 bufs
    vmem_limit = int(min(64 * 2**20, max(16 * 2**20, 4 * est)))

    kernel = functools.partial(_conv_layer_kernel, K=K, TT=TT, nTT=nTT)
    return pl.pallas_call(
        kernel,
        out_shape=jax.ShapeDtypeStruct((N, Cout, Tout), out_dtype),
        grid=(N, nTT),
        in_specs=[
            # Full-time streams; block index ignores j -> DMA'd once per batch element
            # and kept VMEM-resident across the time-tile axis.
            pl.BlockSpec((1, Cin, L), lambda n, j: (n, 0, 0)),
            pl.BlockSpec((1, Cin, L), lambda n, j: (n, 0, 0)),
            pl.BlockSpec((K, Cout, Cin), lambda n, j: (0, 0, 0)),
            pl.BlockSpec((Cout, 1), lambda n, j: (0, 0)),
        ],
        # Lane-dense output: time (TT) on the 128-lane axis, channels on sublanes.
        out_specs=pl.BlockSpec((1, Cout, TT), lambda n, j: (n, 0, j)),
        compiler_params=pltpu.CompilerParams(
            dimension_semantics=("parallel", "parallel"),   # v7x: shard grid over 2 TCs
            vmem_limit_bytes=vmem_limit,
        ),
    )(xe, xo, wk, b2)


# ---------------------------------------------------------------------------
# Full forward pass equivalent to MotionEncoder.forward (PrintLayer is a no-op).
# ---------------------------------------------------------------------------
def motion_encoder_forward(x_nct, params, kernel_size=5):
    """x_nct: (N, C0, T) float32, same NCL layout as the PyTorch module."""
    x32 = x_nct.astype(jnp.float32)

    # BatchNorm1d(channels[0]) in TRAINING mode (batch statistics, biased variance),
    # matching nn.BatchNorm1d's default forward. Two-pass mean / centered variance
    # avoids E[x^2]-mean^2 cancellation. The tiny per-channel reduction stays in XLA
    # (as suggested in the review); the normalization is folded exactly into the
    # first conv's weights/bias (reflection padding commutes with a per-channel
    # affine), so it adds no kernel work and no extra HBM round trip of x.
    # NOTE: eval-mode semantics would require running_mean/var to be plumbed in.
    mean = jnp.mean(x32, axis=(0, 2))
    var = jnp.mean(jnp.square(x32 - mean[None, :, None]), axis=(0, 2))
    scale = params["bn_gamma"] * lax.rsqrt(var + EPS)        # (C0,)
    shift = params["bn_beta"] - mean * scale                 # (C0,)

    convs = params["convs"]
    w0, b0 = convs[0]
    # conv(scale*x + shift) == conv'(x):
    #   W'[o,i,k] = W[o,i,k] * scale[i],  b'[o] = b[o] + sum_{i,k} W[o,i,k] * shift[i]
    w0f = w0 * scale[None, :, None]
    b0f = b0 + jnp.einsum("oik,i->o", w0, shift)
    layers = [(w0f, b0f)] + list(convs[1:])

    pad = (kernel_size - 2) // 2
    x = x_nct.astype(jnp.bfloat16)        # activations travel HBM<->VMEM as bf16
    for li, (w, b) in enumerate(layers):
        out_dtype = jnp.float32 if li == len(layers) - 1 else jnp.bfloat16
        x = conv1d_reflect_leaky(x, w, b, pad=pad, out_dtype=out_dtype)
    return x                              # (N, C_last, Tout), float32, NCT


# ---------------------------------------------------------------------------
# Pure-JAX reference (f32) for correctness checking.
# ---------------------------------------------------------------------------
def _reference_forward(x_nct, params, kernel_size=5):
    x = x_nct.astype(jnp.float32)
    mean = jnp.mean(x, axis=(0, 2), keepdims=True)
    var = jnp.mean(jnp.square(x - mean), axis=(0, 2), keepdims=True)
    x = (x - mean) * lax.rsqrt(var + EPS)
    x = x * params["bn_gamma"][None, :, None] + params["bn_beta"][None, :, None]
    pad = (kernel_size - 2) // 2
    for w, b in params["convs"]:
        x = jnp.pad(x, ((0, 0), (0, 0), (pad, pad)), mode="reflect")
        x = lax.conv_general_dilated(
            x, w, window_strides=(2,), padding="VALID",
            dimension_numbers=("NCH", "OIH", "NCH"),
            precision=lax.Precision.HIGHEST)
        x = x + b[None, :, None]
        x = jnp.where(x >= 0, x, NEG_SLOPE * x)
    return x


# ---------------------------------------------------------------------------
# Deterministic parameter init (PyTorch-default-like uniform bounds).
# ---------------------------------------------------------------------------
def init_params(key, channels, kernel_size):
    params = {}
    k_bn_g, k_bn_b, key = jax.random.split(key, 3)
    C0 = channels[0]
    params["bn_gamma"] = 1.0 + 0.1 * jax.random.normal(k_bn_g, (C0,), jnp.float32)
    params["bn_beta"] = 0.1 * jax.random.normal(k_bn_b, (C0,), jnp.float32)

    convs = []
    for i in range(len(channels) - 1):
        kw, kb, key = jax.random.split(key, 3)
        cin, cout = channels[i], channels[i + 1]
        fan_in = cin * kernel_size
        bound = 1.0 / jnp.sqrt(fan_in)
        w = jax.random.uniform(kw, (cout, cin, kernel_size), jnp.float32, -bound, bound)
        b = jax.random.uniform(kb, (cout,), jnp.float32, -bound, bound)
        convs.append((w, b))
    params["convs"] = convs
    return params


if __name__ == "__main__":
    channels = (4, 8, 16)
    kernel_size = 5
    N, T = 2, 16

    key = jax.random.PRNGKey(0)
    kx, kp = jax.random.split(key)
    x = jax.random.normal(kx, (N, channels[0], T), dtype=jnp.float32)   # NCT
    params = init_params(kp, channels, kernel_size)

    fwd = jax.jit(functools.partial(motion_encoder_forward, kernel_size=kernel_size))
    y = fwd(x, params)
    jax.block_until_ready(y)

    # Expected shape: (N, channels[-1], Tout) with T=16 -> 7 -> 3.
    assert y.shape == (N, channels[-1], 3), y.shape

    # Numerical check vs. a pure-JAX f32 reference (bf16 MXU operands => loose tol).
    y_ref = _reference_forward(x, params, kernel_size=kernel_size)
    err = float(jnp.max(jnp.abs(y - y_ref)))
    assert jnp.allclose(y, y_ref, rtol=5e-2, atol=5e-2), err

    print("KERNEL_OK")
</pallas_src>

<mosaic_0001>
module attributes {stable_mosaic.version = 11 : i64} {
  func.func @_conv_layer_kernel(%arg0: i32, %arg1: i32, %arg2: memref<1x4x9xbf16, #tpu.memory_space<vmem>>, %arg3: memref<1x4x9xbf16, #tpu.memory_space<vmem>>, %arg4: memref<5x8x4xbf16, #tpu.memory_space<vmem>>, %arg5: memref<8x1xf32, #tpu.memory_space<vmem>>, %arg6: memref<1x8x7xbf16, #tpu.memory_space<vmem>>) attributes {dimension_semantics = [#tpu.dimension_semantics<parallel>, #tpu.dimension_semantics<parallel>], iteration_bounds = array<i64: 2, 1>, scalar_prefetch = 0 : i64, scratch_operands = 0 : i64, tpu.core_type = #tpu.core_type<tc>, window_params = [{transform_indices = @transform_0, window_bounds = array<i64: 1, 4, 9>}, {transform_indices = @transform_1, window_bounds = array<i64: 1, 4, 9>}, {pipeline_mode = #tpu.pipeline_mode<synchronous>, transform_indices = @transform_2, window_bounds = array<i64: 5, 8, 4>}, {pipeline_mode = #tpu.pipeline_mode<synchronous>, transform_indices = @transform_3, window_bounds = array<i64: 8, 1>}, {transform_indices = @transform_4, window_bounds = array<i64: 1, 8, 7>}]} {
    %cst = arith.constant 0.000000e+00 : f32
    %0 = vector.broadcast %cst : f32 to vector<8x7xf32>
    %c0 = arith.constant 0 : index
    %c0_0 = arith.constant 0 : index
    %c0_1 = arith.constant 0 : index
    %1 = vector.load %arg2[%c0, %c0_0, %c0_1] : memref<1x4x9xbf16, #tpu.memory_space<vmem>>, vector<1x4x7xbf16>
    %2 = vector.shape_cast %1 : vector<1x4x7xbf16> to vector<4x7xbf16>
    %c0_2 = arith.constant 0 : index
    %c0_3 = arith.constant 0 : index
    %c0_4 = arith.constant 0 : index
    %3 = vector.load %arg4[%c0_2, %c0_3, %c0_4] : memref<5x8x4xbf16, #tpu.memory_space<vmem>>, vector<1x8x4xbf16>
    %4 = vector.shape_cast %3 : vector<1x8x4xbf16> to vector<8x4xbf16>
    %cst_5 = arith.constant dense<0.000000e+00> : vector<8x7xf32>
    %5 = tpu.matmul %4, %2, %cst_5 {dimension_numbers = #tpu.dot_dimension_numbers<[1], [0], [0], [1], [0, 0, 1, 1], [], []>} : vector<8x4xbf16>, vector<4x7xbf16>, vector<8x7xf32> -> vector<8x7xf32>
    %6 = arith.addf %0, %5 : vector<8x7xf32>
    %c0_6 = arith.constant 0 : index
    %c0_7 = arith.constant 0 : index
    %c0_8 = arith.constant 0 : index
    %7 = vector.load %arg3[%c0_6, %c0_7, %c0_8] : memref<1x4x9xbf16, #tpu.memory_space<vmem>>, vector<1x4x7xbf16>
    %8 = vector.shape_cast %7 : vector<1x4x7xbf16> to vector<4x7xbf16>
    %c1 = arith.constant 1 : index
    %c0_9 = arith.constant 0 : index
    %c0_10 = arith.constant 0 : index
    %9 = vector.load %arg4[%c1, %c0_9, %c0_10] : memref<5x8x4xbf16, #tpu.memory_space<vmem>>, vector<1x8x4xbf16>
    %10 = vector.shape_cast %9 : vector<1x8x4xbf16> to vector<8x4xbf16>
    %cst_11 = arith.constant dense<0.000000e+00> : vector<8x7xf32>
    %11 = tpu.matmul %10, %8, %cst_11 {dimension_numbers = #tpu.dot_dimension_numbers<[1], [0], [0], [1], [0, 0, 1, 1], [], []>} : vector<8x4xbf16>, vector<4x7xbf16>, vector<8x7xf32> -> vector<8x7xf32>
    %12 = arith.addf %6, %11 : vector<8x7xf32>
    %c0_12 = arith.constant 0 : index
    %c0_13 = arith.constant 0 : index
    %c1_14 = arith.constant 1 : index
    %13 = vector.load %arg2[%c0_12, %c0_13, %c1_14] : memref<1x4x9xbf16, #tpu.memory_space<vmem>>, vector<1x4x7xbf16>
    %14 = vector.shape_cast %13 : vector<1x4x7xbf16> to vector<4x7xbf16>
    %c2 = arith.constant 2 : index
    %c0_15 = arith.constant 0 : index
    %c0_16 = arith.constant 0 : index
    %15 = vector.load %arg4[%c2, %c0_15, %c0_16] : memref<5x8x4xbf16, #tpu.memory_space<vmem>>, vector<1x8x4xbf16>
    %16 = vector.shape_cast %15 : vector<1x8x4xbf16> to vector<8x4xbf16>
    %cst_17 = arith.constant dense<0.000000e+00> : vector<8x7xf32>
    %17 = tpu.matmul %16, %14, %cst_17 {dimension_numbers = #tpu.dot_dimension_numbers<[1], [0], [0], [1], [0, 0, 1, 1], [], []>} : vector<8x4xbf16>, vector<4x7xbf16>, vector<8x7xf32> -> vector<8x7xf32>
    %18 = arith.addf %12, %17 : vector<8x7xf32>
    %c0_18 = arith.constant 0 : index
    %c0_19 = arith.constant 0 : index
    %c1_20 = arith.constant 1 : index
    %19 = vector.load %arg3[%c0_18, %c0_19, %c1_20] : memref<1x4x9xbf16, #tpu.memory_space<vmem>>, vector<1x4x7xbf16>
    %20 = vector.shape_cast %19 : vector<1x4x7xbf16> to vector<4x7xbf16>
    %c3 = arith.constant 3 : index
    %c0_21 = arith.constant 0 : index
    %c0_22 = arith.constant 0 : index
    %21 = vector.load %arg4[%c3, %c0_21, %c0_22] : memref<5x8x4xbf16, #tpu.memory_space<vmem>>, vector<1x8x4xbf16>
    %22 = vector.shape_cast %21 : vector<1x8x4xbf16> to vector<8x4xbf16>
    %cst_23 = arith.constant dense<0.000000e+00> : vector<8x7xf32>
    %23 = tpu.matmul %22, %20, %cst_23 {dimension_numbers = #tpu.dot_dimension_numbers<[1], [0], [0], [1], [0, 0, 1, 1], [], []>} : vector<8x4xbf16>, vector<4x7xbf16>, vector<8x7xf32> -> vector<8x7xf32>
    %24 = arith.addf %18, %23 : vector<8x7xf32>
    %c0_24 = arith.constant 0 : index
    %c0_25 = arith.constant 0 : index
    %c2_26 = arith.constant 2 : index
    %25 = vector.load %arg2[%c0_24, %c0_25, %c2_26] : memref<1x4x9xbf16, #tpu.memory_space<vmem>>, vector<1x4x7xbf16>
    %26 = vector.shape_cast %25 : vector<1x4x7xbf16> to vector<4x7xbf16>
    %c4 = arith.constant 4 : index
    %c0_27 = arith.constant 0 : index
    %c0_28 = arith.constant 0 : index
    %27 = vector.load %arg4[%c4, %c0_27, %c0_28] : memref<5x8x4xbf16, #tpu.memory_space<vmem>>, vector<1x8x4xbf16>
    %28 = vector.shape_cast %27 : vector<1x8x4xbf16> to vector<8x4xbf16>
    %cst_29 = arith.constant dense<0.000000e+00> : vector<8x7xf32>
    %29 = tpu.matmul %28, %26, %cst_29 {dimension_numbers = #tpu.dot_dimension_numbers<[1], [0], [0], [1], [0, 0, 1, 1], [], []>} : vector<8x4xbf16>, vector<4x7xbf16>, vector<8x7xf32> -> vector<8x7xf32>
    %30 = arith.addf %24, %29 : vector<8x7xf32>
    %c0_30 = arith.constant 0 : index
    %c0_31 = arith.constant 0 : index
    %31 = vector.load %arg5[%c0_30, %c0_31] : memref<8x1xf32, #tpu.memory_space<vmem>>, vector<8x1xf32>
    %32 = vector.broadcast %31 : vector<8x1xf32> to vector<8x7xf32>
    %33 = arith.addf %30, %32 : vector<8x7xf32>
    %cst_32 = arith.constant 0.000000e+00 : f32
    %34 = vector.broadcast %cst_32 : f32 to vector<8x7xf32>
    %35 = arith.cmpf oge, %33, %34 : vector<8x7xf32>
    %cst_33 = arith.constant 2.000000e-01 : f32
    %36 = vector.broadcast %cst_33 : f32 to vector<8x7xf32>
    %37 = arith.mulf %36, %33 : vector<8x7xf32>
    %38 = arith.select %35, %33, %37 : vector<8x7xi1>, vector<8x7xf32>
    %39 = arith.truncf %38 : vector<8x7xf32> to vector<8x7xbf16>
    %c0_34 = arith.constant 0 : index
    %c0_35 = arith.constant 0 : index
    %c0_36 = arith.constant 0 : index
    %40 = vector.load %arg6[%c0_34, %c0_35, %c0_36] : memref<1x8x7xbf16, #tpu.memory_space<vmem>>, vector<1x8x7xbf16>
    %41 = vector.shape_cast %40 : vector<1x8x7xbf16> to vector<8x7xbf16>
    %42 = vector.shape_cast %39 : vector<8x7xbf16> to vector<1x8x7xbf16>
    tpu.vector_store %arg6[%c0_34, %c0_35, %c0_36], %42 {strides = array<i32>} : memref<1x8x7xbf16, #tpu.memory_space<vmem>>, vector<1x8x7xbf16>,
    return
  }
  func.func @transform_0(%arg0: i32, %arg1: i32) -> (i32, i32, i32) {
    %c0_i32 = arith.constant 0 : i32
    %c0_i32_0 = arith.constant 0 : i32
    %c0_i32_1 = arith.constant 0 : i32
    return %arg0, %c0_i32, %c0_i32_0 : i32, i32, i32
  }
  func.func @transform_1(%arg0: i32, %arg1: i32) -> (i32, i32, i32) {
    %c0_i32 = arith.constant 0 : i32
    %c0_i32_0 = arith.constant 0 : i32
    %c0_i32_1 = arith.constant 0 : i32
    return %arg0, %c0_i32, %c0_i32_0 : i32, i32, i32
  }
  func.func @transform_2(%arg0: i32, %arg1: i32) -> (i32, i32, i32) {
    %c0_i32 = arith.constant 0 : i32
    %c0_i32_0 = arith.constant 0 : i32
    %c0_i32_1 = arith.constant 0 : i32
    %c0_i32_2 = arith.constant 0 : i32
    return %c0_i32, %c0_i32_0, %c0_i32_1 : i32, i32, i32
  }
  func.func @transform_3(%arg0: i32, %arg1: i32) -> (i32, i32) {
    %c0_i32 = arith.constant 0 : i32
    %c0_i32_0 = arith.constant 0 : i32
    %c0_i32_1 = arith.constant 0 : i32
    return %c0_i32, %c0_i32_0 : i32, i32
  }
  func.func @transform_4(%arg0: i32, %arg1: i32) -> (i32, i32, i32) {
    %c0_i32 = arith.constant 0 : i32
    %c0_i32_0 = arith.constant 0 : i32
    return %arg0, %c0_i32, %arg1 : i32, i32, i32
  }
}

module attributes {stable_mosaic.version = 11 : i64} {
  func.func @_conv_layer_kernel(%arg0: i32, %arg1: i32, %arg2: memref<1x8x5xbf16, #tpu.memory_space<vmem>>, %arg3: memref<1x8x5xbf16, #tpu.memory_space<vmem>>, %arg4: memref<5x16x8xbf16, #tpu.memory_space<vmem>>, %arg5: memref<16x1xf32, #tpu.memory_space<vmem>>, %arg6: memref<1x16x3xf32, #tpu.memory_space<vmem>>) attributes {dimension_semantics = [#tpu.dimension_semantics<parallel>, #tpu.dimension_semantics<parallel>], iteration_bounds = array<i64: 2, 1>, scalar_prefetch = 0 : i64, scratch_operands = 0 : i64, tpu.core_type = #tpu.core_type<tc>, window_params = [{transform_indices = @transform_0, window_bounds = array<i64: 1, 8, 5>}, {transform_indices = @transform_1, window_bounds = array<i64: 1, 8, 5>}, {pipeline_mode = #tpu.pipeline_mode<synchronous>, transform_indices = @transform_2, window_bounds = array<i64: 5, 16, 8>}, {pipeline_mode = #tpu.pipeline_mode<synchronous>, transform_indices = @transform_3, window_bounds = array<i64: 16, 1>}, {transform_indices = @transform_4, window_bounds = array<i64: 1, 16, 3>}]} {
    %cst = arith.constant 0.000000e+00 : f32
    %0 = vector.broadcast %cst : f32 to vector<16x3xf32>
    %c0 = arith.constant 0 : index
    %c0_0 = arith.constant 0 : index
    %c0_1 = arith.constant 0 : index
    %1 = vector.load %arg2[%c0, %c0_0, %c0_1] : memref<1x8x5xbf16, #tpu.memory_space<vmem>>, vector<1x8x3xbf16>
    %2 = vector.shape_cast %1 : vector<1x8x3xbf16> to vector<8x3xbf16>
    %c0_2 = arith.constant 0 : index
    %c0_3 = arith.constant 0 : index
    %c0_4 = arith.constant 0 : index
    %3 = vector.load %arg4[%c0_2, %c0_3, %c0_4] : memref<5x16x8xbf16, #tpu.memory_space<vmem>>, vector<1x16x8xbf16>
    %4 = vector.shape_cast %3 : vector<1x16x8xbf16> to vector<16x8xbf16>
    %cst_5 = arith.constant dense<0.000000e+00> : vector<16x3xf32>
    %5 = tpu.matmul %4, %2, %cst_5 {dimension_numbers = #tpu.dot_dimension_numbers<[1], [0], [0], [1], [0, 0, 1, 1], [], []>} : vector<16x8xbf16>, vector<8x3xbf16>, vector<16x3xf32> -> vector<16x3xf32>
    %6 = arith.addf %0, %5 : vector<16x3xf32>
    %c0_6 = arith.constant 0 : index
    %c0_7 = arith.constant 0 : index
    %c0_8 = arith.constant 0 : index
    %7 = vector.load %arg3[%c0_6, %c0_7, %c0_8] : memref<1x8x5xbf16, #tpu.memory_space<vmem>>, vector<1x8x3xbf16>
    %8 = vector.shape_cast %7 : vector<1x8x3xbf16> to vector<8x3xbf16>
    %c1 = arith.constant 1 : index
    %c0_9 = arith.constant 0 : index
    %c0_10 = arith.constant 0 : index
    %9 = vector.load %arg4[%c1, %c0_9, %c0_10] : memref<5x16x8xbf16, #tpu.memory_space<vmem>>, vector<1x16x8xbf16>
    %10 = vector.shape_cast %9 : vector<1x16x8xbf16> to vector<16x8xbf16>
    %cst_11 = arith.constant dense<0.000000e+00> : vector<16x3xf32>
    %11 = tpu.matmul %10, %8, %cst_11 {dimension_numbers = #tpu.dot_dimension_numbers<[1], [0], [0], [1], [0, 0, 1, 1], [], []>} : vector<16x8xbf16>, vector<8x3xbf16>, vector<16x3xf32> -> vector<16x3xf32>
    %12 = arith.addf %6, %11 : vector<16x3xf32>
    %c0_12 = arith.constant 0 : index
    %c0_13 = arith.constant 0 : index
    %c1_14 = arith.constant 1 : index
    %13 = vector.load %arg2[%c0_12, %c0_13, %c1_14] : memref<1x8x5xbf16, #tpu.memory_space<vmem>>, vector<1x8x3xbf16>
    %14 = vector.shape_cast %13 : vector<1x8x3xbf16> to vector<8x3xbf16>
    %c2 = arith.constant 2 : index
    %c0_15 = arith.constant 0 : index
    %c0_16 = arith.constant 0 : index
    %15 = vector.load %arg4[%c2, %c0_15, %c0_16] : memref<5x16x8xbf16, #tpu.memory_space<vmem>>, vector<1x16x8xbf16>
    %16 = vector.shape_cast %15 : vector<1x16x8xbf16> to vector<16x8xbf16>
    %cst_17 = arith.constant dense<0.000000e+00> : vector<16x3xf32>
    %17 = tpu.matmul %16, %14, %cst_17 {dimension_numbers = #tpu.dot_dimension_numbers<[1], [0], [0], [1], [0, 0, 1, 1], [], []>} : vector<16x8xbf16>, vector<8x3xbf16>, vector<16x3xf32> -> vector<16x3xf32>
    %18 = arith.addf %12, %17 : vector<16x3xf32>
    %c0_18 = arith.constant 0 : index
    %c0_19 = arith.constant 0 : index
    %c1_20 = arith.constant 1 : index
    %19 = vector.load %arg3[%c0_18, %c0_19, %c1_20] : memref<1x8x5xbf16, #tpu.memory_space<vmem>>, vector<1x8x3xbf16>
    %20 = vector.shape_cast %19 : vector<1x8x3xbf16> to vector<8x3xbf16>
    %c3 = arith.constant 3 : index
    %c0_21 = arith.constant 0 : index
    %c0_22 = arith.constant 0 : index
    %21 = vector.load %arg4[%c3, %c0_21, %c0_22] : memref<5x16x8xbf16, #tpu.memory_space<vmem>>, vector<1x16x8xbf16>
    %22 = vector.shape_cast %21 : vector<1x16x8xbf16> to vector<16x8xbf16>
    %cst_23 = arith.constant dense<0.000000e+00> : vector<16x3xf32>
    %23 = tpu.matmul %22, %20, %cst_23 {dimension_numbers = #tpu.dot_dimension_numbers<[1], [0], [0], [1], [0, 0, 1, 1], [], []>} : vector<16x8xbf16>, vector<8x3xbf16>, vector<16x3xf32> -> vector<16x3xf32>
    %24 = arith.addf %18, %23 : vector<16x3xf32>
    %c0_24 = arith.constant 0 : index
    %c0_25 = arith.constant 0 : index
    %c2_26 = arith.constant 2 : index
    %25 = vector.load %arg2[%c0_24, %c0_25, %c2_26] : memref<1x8x5xbf16, #tpu.memory_space<vmem>>, vector<1x8x3xbf16>
    %26 = vector.shape_cast %25 : vector<1x8x3xbf16> to vector<8x3xbf16>
    %c4 = arith.constant 4 : index
    %c0_27 = arith.constant 0 : index
    %c0_28 = arith.constant 0 : index
    %27 = vector.load %arg4[%c4, %c0_27, %c0_28] : memref<5x16x8xbf16, #tpu.memory_space<vmem>>, vector<1x16x8xbf16>
    %28 = vector.shape_cast %27 : vector<1x16x8xbf16> to vector<16x8xbf16>
    %cst_29 = arith.constant dense<0.000000e+00> : vector<16x3xf32>
    %29 = tpu.matmul %28, %26, %cst_29 {dimension_numbers = #tpu.dot_dimension_numbers<[1], [0], [0], [1], [0, 0, 1, 1], [], []>} : vector<16x8xbf16>, vector<8x3xbf16>, vector<16x3xf32> -> vector<16x3xf32>
    %30 = arith.addf %24, %29 : vector<16x3xf32>
    %c0_30 = arith.constant 0 : index
    %c0_31 = arith.constant 0 : index
    %31 = vector.load %arg5[%c0_30, %c0_31] : memref<16x1xf32, #tpu.memory_space<vmem>>, vector<16x1xf32>
    %32 = vector.broadcast %31 : vector<16x1xf32> to vector<16x3xf32>
    %33 = arith.addf %30, %32 : vector<16x3xf32>
    %cst_32 = arith.constant 0.000000e+00 : f32
    %34 = vector.broadcast %cst_32 : f32 to vector<16x3xf32>
    %35 = arith.cmpf oge, %33, %34 : vector<16x3xf32>
    %cst_33 = arith.constant 2.000000e-01 : f32
    %36 = vector.broadcast %cst_33 : f32 to vector<16x3xf32>
    %37 = arith.mulf %36, %33 : vector<16x3xf32>
    %38 = arith.select %35, %33, %37 : vector<16x3xi1>, vector<16x3xf32>
    %c0_34 = arith.constant 0 : index
    %c0_35 = arith.constant 0 : index
    %c0_36 = arith.constant 0 : index
    %39 = vector.load %arg6[%c0_34, %c0_35, %c0_36] : memref<1x16x3xf32, #tpu.memory_space<vmem>>, vector<1x16x3xf32>
    %40 = vector.shape_cast %39 : vector<1x16x3xf32> to vector<16x3xf32>
    %41 = vector.shape_cast %38 : vector<16x3xf32> to vector<1x16x3xf32>
    tpu.vector_store %arg6[%c0_34, %c0_35, %c0_36], %41 {strides = array<i32>} : memref<1x16x3xf32, #tpu.memory_space<vmem>>, vector<1x16x3xf32>,
    return
  }
  func.func @transform_0(%arg0: i32, %arg1: i32) -> (i32, i32, i32) {
    %c0_i32 = arith.constant 0 : i32
    %c0_i32_0 = arith.constant 0 : i32
    %c0_i32_1 = arith.constant 0 : i32
    return %arg0, %c0_i32, %c0_i32_0 : i32, i32, i32
  }
  func.func @transform_1(%arg0: i32, %arg1: i32) -> (i32, i32, i32) {
    %c0_i32 = arith.constant 0 : i32
    %c0_i32_0 = arith.constant 0 : i32
    %c0_i32_1 = arith.constant 0 : i32
    return %arg0, %c0_i32, %c0_i32_0 : i32, i32, i32
  }
  func.func @transform_2(%arg0: i32, %arg1: i32) -> (i32, i32, i32) {
    %c0_i32 = arith.constant 0 : i32
    %c0_i32_0 = arith.constant 0 : i32
    %c0_i32_1 = arith.constant 0 : i32
    %c0_i32_2 = arith.constant 0 : i32
    return %c0_i32, %c0_i32_0, %c0_i32_1 : i32, i32, i32
  }
  func.func @transform_3(%arg0: i32, %arg1: i32) -> (i32, i32) {
    %c0_i32 = arith.constant 0 : i32
    %c0_i32_0 = arith.constant 0 : i32
    %c0_i32_1 = arith.constant 0 : i32
    return %c0_i32, %c0_i32_0 : i32, i32
  }
  func.func @transform_4(%arg0: i32, %arg1: i32) -> (i32, i32, i32) {
    %c0_i32 = arith.constant 0 : i32
    %c0_i32_0 = arith.constant 0 : i32
    return %arg0, %c0_i32, %arg1 : i32, i32, i32
  }
}

</mosaic_0001>

<bundles_post_ra>
// kernel: motion_encoder_forward.2
= control target key start
LH: loop header
LB: loop body
LE: loop exit
PB: predicated region body
PF: predicated region fallthrough
CT: control target
= control target key end

     0   :  { %s753_s15 = smov 0   ;;  %s755_s16 = smov 0   ;;  %s826_s0 = inlined_call_operand.vmem [shape: bf16[2,4,9], index: 0, kind: input, shape index: {}]   ;;  %s827_s1 = inlined_call_operand.vmem [shape: bf16[2,4,9], index: 1, kind: input, shape index: {}]   ;;  %s828_s2 = inlined_call_operand.vmem [shape: bf16[5,8,4], index: 2, kind: input, shape index: {}]   ;;  %s829_s3 = inlined_call_operand.vmem [shape: f32[8,1], index: 3, kind: input, shape index: {}]   ;;  %s830_s4 = inlined_call_operand.vmem [shape: bf16[2,8,7], index: 4, kind: output, shape index: {}]  }
   0x1   :  { %s757_s17 = smov 0  }
   0x2 LB: > { %s26_s18 = sadd.s32 1, %s716_s16  ;;  %p609_p0 = scmp.ge.s32.totalorder %s720_s17, 1  ;;  %s720_s17 = sphi %s757_s17, %s14_s17   ;;  %s716_s16 = sphi %s755_s16, %s832_s16   ;;  %s712_s15 = sphi %s753_s15, %s831_s15  }
   0x3   : > { %p28_p1 = scmp.ge.s32.totalorder %s26_s18, 2  ;;  %p184_p2 = scmp.lt.s32.totalorder %s720_s17, 3 }
   0x5   : > { %s834_s18 = smov (%p28_p1, %s26_s18), 0  ;;  %p185_p3 = pnand %p609_p0, %p184_p2 }
   0x6   : > { %p215_p4 = scmp.lt.s32.totalorder (!%p185_p3), %s712_s15, 1  ;;  %v336_v0 = vlaneseq (!%p185_p3)  ;;  %v722_v1 = vmov (!%p185_p3), 1983009808   ;;  %v723_v3 = vmov (!%p185_p3), 0.0   ;;  %vm724_vm0 = vmmov (!%p185_p3), 0   ;;  %s725_s26 = smov (!%p185_p3), 126  }
   0x7   : > { %188 = sbr.rel (%p185_p3) target bundleno = 369 (0x171), region = 36  ;;  %v334_v2 = vunpack.c.l.s4 (!%p185_p3), %v722_v1  ;;  %636 = vmatprep.subr.bf16.mxu0 (!%p185_p3), %v723_v3  ;;  %642 = vmatprep.subr.bf16.mxu1 (!%p185_p3), %v723_v3  ;;  %vm240_vm1 = vcmask (!%p185_p3), 1041408   ;;  %s726_s27 = smov (!%p185_p3), 127   ;;  %v613_v13 = vld [vmem:[%s828_s2 + $0x4] sm:$0xf] (!%p185_p3)  ;;  %vm236_vm2 = vcmask (!%p185_p3), 31744  }
   0x8   : > { %v337_v4 = vshrl.u32 (!%p185_p3), %v336_v0, 7  ;;  %638 = vmatprep.mubr.msk.bf16.mxu0 (!%p185_p3), %vm724_vm0, %v723_v3  ;;  %644 = vmatprep.mubr.msk.bf16.mxu1 (!%p185_p3), %vm724_vm0, %v723_v3  ;;  %v509_v14 = vld [vmem:[%s829_s3] sm:$0xff] (!%p185_p3)  ;;  %v727_v17 = vmov (!%p185_p3), 0   ;;  %v616_v21 = vld [vmem:[%s828_s2 + $0x8] sm:$0xf] (!%p185_p3)  ;;  %vm520_vm4 = vcmask (!%p185_p3), 52224  }
   0x9   : > { %v335_v5 = vunpack.c.0.s8 (!%p185_p3), %v334_v2  ;;  %v232_v16 = vld [vmem:[%s828_s2] sm:$0xf] (!%p185_p3)  ;;  %696 = vset.pattern.permute.xlu1 (!%p185_p3), %v727_v17  ;;  %697 = vset.pattern.permute.xlu0 (!%p185_p3), %v727_v17  ;;  %v618_v25 = vld [vmem:[%s828_s2 + $0xc] sm:$0xf] (!%p185_p3)  ;;  %v621_v26 = vld [vmem:[%s828_s2 + $0x10] sm:$0xf] (!%p185_p3) }
   0xb   : > { %v338_v6 = vsub.s32 (!%p185_p3), %v335_v5, %v337_v4 }
   0xe   : > { %s836_s15 = smov (!%p215_p4, %s712_s15), 1 }
   0xf   : > { %s610_s19 = sshll.u32 %s836_s15, 1  ;;  %s612_s14 = sshll.u32 %s836_s15, 2 }
  0x10   : > { %s218_s22 = scalar_lea.vmem %s826_s0, %s610_s19  ;;  %s222_s25 = scalar_lea.vmem %s827_s1, %s610_s19 }
  0x11   : > { %v231_v7 = vld [vmem:[%s218_s22] sm:$0x3]  ;;  %s229_s21 = scalar_lea.vmem %s830_s4, %s612_s14 }
  0x12   : > { %v622_v8 = vld.sshfl [vmem:[%s218_s22] sm:$0x3 pattern:$0x76325410]  ;;  %v339_v9 = vrot.slane %v231_v7, %v338_v6  ;;  %v288_v12 = vsel %vm240_vm1, %v231_v7, 0 }
  0x13   : > { %460 = vrot.lane.b32.xlu1 %v622_v8, %s725_s26  ;;  %v233_v10 = vld [vmem:[%s222_s25] sm:$0x3]  ;;  %643 = vmatpush3.bf16.msra.mxu1 %v288_v12 }
  0x14   : > { %v242_v11 = vsel %vm240_vm1, %v233_v10, 0  ;;  %340 = vrot.lane.b32.xlu0 %v339_v9, %s726_s27  ;;  %v619_v15 = vld.sshfl [vmem:[%s222_s25] sm:$0x3 pattern:$0x76325410]  ;;  %654 = vmatprep.subr.bf16.mxu1 %v723_v3 }
  0x15   : > { %637 = vmatpush3.bf16.msra.mxu0 %v242_v11 }
  0x16   : > { %648 = vmatprep.subr.bf16.mxu0 %v723_v3  ;;  %645 = vmatmul.mubr.msk.bf16.vlgmr.msra.gmra.mrb[0].mxu1 %vm236_vm2, %v232_v16 }
  0x17   : > { %512 = vperm.xlu1 %696, %v509_v14   ;;  %656 = vmatprep.mubr.msk.bf16.mxu1 %vm724_vm0, %v723_v3 }
  0x18   : > { %639 = vmatmul.mubr.msk.bf16.vlgmr.msra.gmra.mrb[0].mxu0 %vm236_vm2, %v613_v13  ;;  %400 = vrot.lane.b32.xlu0 %v619_v15, %s726_s27 }
  0x19   : > { %650 = vmatprep.mubr.msk.bf16.mxu0 %vm724_vm0, %v723_v3 }
  0x85   : > { %v461_v19 = vpop.permute.xlu1 %460 }
  0x86   : > { %v341_v18 = vpop.permute.xlu0 %340  ;;  %v466_v22 = vsel %vm240_vm1, %v461_v19, 0 }
  0x87   : > { %v346_v20 = vsel %vm240_vm1, %v341_v18, 0 }
  0x88   : > { %649 = vmatpush3.bf16.msra.mxu0 %v346_v20 }
  0x89   : > { %660 = vmatprep.subr.bf16.mxu0 %v723_v3 }
  0x8a   : > { %v401_v23 = vpop.permute.xlu0 %400 }
  0x8b   : > { %v406_v24 = vsel %vm240_vm1, %v401_v23, 0  ;;  %651 = vmatmul.mubr.msk.bf16.vlgmr.msra.gmra.mrb[4].mxu0 %vm236_vm2, %v616_v21 }
  0x8c   : > { %655 = vmatpush3.bf16.msra.mxu1 %v406_v24  ;;  %661 = vmatpush3.bf16.msra.mxu0 %v466_v22 }
  0x8d   : > { %662 = vmatprep.mubr.msk.bf16.mxu0 %vm724_vm0, %v723_v3 }
  0x8f   : > { %657 = vmatmul.mubr.msk.bf16.vlgmr.msra.gmra.mrb[4].mxu1 %vm236_vm2, %v618_v25 }
  0x93   : > { %663 = vmatmul.mubr.msk.bf16.vlgmr.msra.gmra.mrb[8].mxu0 %vm236_vm2, %v621_v26 }
  0x96   : > { %v513_v47 = vpop.permute.xlu1 %512 }
  0xe9   : > { %v324_v29 = vpop.f32.mrb[0].mxu1 }
  0xea   : > { %v646_v32 = vpop.f32.mrb[1].mxu1 }
  0xeb   : > { %v278_v27 = vpop.f32.mrb[0].mxu0  ;;  %v327_v34 = vpop.f32.mrb[2].mxu1 }
  0xec   : > { %v640_v28 = vpop.f32.mrb[1].mxu0  ;;  %v325_v31 = vadd.f32 %v324_v29, %v278_v27  ;;  %v647_v35 = vpop.f32.mrb[3].mxu1 }
  0xed   : > { %v281_v30 = vpop.f32.mrb[2].mxu0 }
  0xee   : > { %v641_v33 = vpop.f32.mrb[3].mxu0 }
 0x15e   : > { %v382_v36 = vpop.f32.mrb[4].mxu0 }
 0x15f   : > { %v388_v37 = vadd.f32 %v382_v36, %v325_v31  ;;  %v652_v38 = vpop.f32.mrb[5].mxu0 }
 0x160   : > { %v385_v39 = vpop.f32.mrb[6].mxu0 }
 0x161   : > { %v653_v40 = vpop.f32.mrb[7].mxu0 }
 0x162   : > { %v442_v41 = vpop.f32.mrb[4].mxu1 }
 0x163   : > { %v448_v42 = vadd.f32 %v442_v41, %v388_v37  ;;  %v658_v43 = vpop.f32.mrb[5].mxu1 }
 0x164   : > { %v445_v44 = vpop.f32.mrb[6].mxu1 }
 0x165   : > { %v659_v45 = vpop.f32.mrb[7].mxu1 }
 0x166   : > { %v502_v46 = vpop.f32.mrb[8].mxu0 }
 0x167   : > { %v508_v48 = vadd.f32 %v502_v46, %v448_v42  ;;  %v664_v49 = vpop.f32.mrb[9].mxu0 }
 0x168   : > { %v505_v50 = vpop.f32.mrb[10].mxu0 }
 0x169   : > { %v515_v51 = vadd.f32 %v513_v47, %v508_v48  ;;  %v665_v52 = vpop.f32.mrb[11].mxu0 }
 0x16b   : > { %vm516_vm3 = vcmp.ge.f32.partialorder %v515_v51, 0.0  ;;  %v517_v53 = vmul.f32 0.2, %v515_v51 }
 0x16d   : > { %v518_v54 = vsel %vm516_vm3, %v515_v51, %v517_v53 }
 0x16e   : > { %v519_v55 = vpack.c.bf16 %v518_v54, %v518_v54 }
 0x170   : > { %521 = vst.msk [vmem:[%s229_s21] sm:$0xf] %vm520_vm4, %v519_v55 }
 0x171 PF: > { %s14_s17 = sadd.s32 1, %s720_s17   ;;  %s831_s15 = smov %s716_s16 }
 0x172   : > { %p11_p5 = scmp.ge.s32.totalorder %s14_s17, 4   ;;  %s832_s16 = smov %s834_s18 }
 0x174   :  { %13 = sbr.rel (!%p11_p5) target bundleno = 2 (0x2), region = 73 }

// kernel: motion_encoder_forward.3
= control target key start
LH: loop header
LB: loop body
LE: loop exit
PB: predicated region body
PF: predicated region fallthrough
CT: control target
= control target key end

     0   :  { %s805_s15 = smov 0   ;;  %s807_s16 = smov 0   ;;  %s881_s0 = inlined_call_operand.vmem [shape: bf16[2,8,5], index: 0, kind: input, shape index: {}]   ;;  %s882_s1 = inlined_call_operand.vmem [shape: bf16[2,8,5], index: 1, kind: input, shape index: {}]   ;;  %s883_s2 = inlined_call_operand.vmem [shape: bf16[5,16,8], index: 2, kind: input, shape index: {}]   ;;  %s884_s3 = inlined_call_operand.vmem [shape: f32[16,1], index: 3, kind: input, shape index: {}]   ;;  %s885_s4 = inlined_call_operand.vmem [shape: f32[2,16,3], index: 4, kind: output, shape index: {}]  }
   0x1   :  { %s809_s17 = smov 0  }
   0x2 LB: > { %s26_s18 = sadd.s32 1, %s769_s16  ;;  %p645_p0 = scmp.ge.s32.totalorder %s773_s17, 1  ;;  %s773_s17 = sphi %s809_s17, %s14_s17   ;;  %s769_s16 = sphi %s807_s16, %s887_s16   ;;  %s765_s15 = sphi %s805_s15, %s886_s15  }
   0x3   : > { %p28_p1 = scmp.ge.s32.totalorder %s26_s18, 2  ;;  %p184_p2 = scmp.lt.s32.totalorder %s773_s17, 3 }
   0x5   : > { %s889_s18 = smov (%p28_p1, %s26_s18), 0  ;;  %p185_p3 = pnand %p645_p0, %p184_p2 }
   0x6   : > { %p216_p4 = scmp.lt.s32.totalorder (!%p185_p3), %s765_s15, 1  ;;  %v775_v0 = vmov (!%p185_p3), 0.0   ;;  %vm776_vm0 = vmmov (!%p185_p3), 0   ;;  %vm249_vm1 = vcmask (!%p185_p3), 1043456   ;;  %v746_v5 = vld [vmem:[%s883_s2 + $0x8] sm:$0xff] (!%p185_p3)   ;;  %v747_v7 = vld [vmem:[%s883_s2] sm:$0xff] (!%p185_p3)  }
   0x7   : > { %188 = sbr.rel (%p185_p3) target bundleno = 369 (0x171), region = 36  ;;  %683 = vmatprep.subr.bf16.mxu0 (!%p185_p3), %v775_v0  ;;  %685 = vmatprep.mubr.msk.bf16.mxu0 (!%p185_p3), %vm776_vm0, %v775_v0  ;;  %vm245_vm2 = vcmask (!%p185_p3), 64512   ;;  %s777_s30 = smov (!%p185_p3), 127   ;;  %v529_v9 = vld [vmem:[%s884_s3] sm:$0xff] (!%p185_p3)  ;;  %v779_v10 = vmov (!%p185_p3), 0   ;;  %v530_v11 = vld [vmem:[%s884_s3 + $0x8] sm:$0xff] (!%p185_p3) }
   0x8   : > { %689 = vmatprep.subr.bf16.mxu1 (!%p185_p3), %v775_v0  ;;  %691 = vmatprep.mubr.msk.bf16.mxu1 (!%p185_p3), %vm776_vm0, %v775_v0  ;;  %s778_s5 = smov (!%p185_p3), 126   ;;  %v748_v15 = vld [vmem:[%s883_s2 + $0x10] sm:$0xff] (!%p185_p3)   ;;  %v749_v19 = vld [vmem:[%s883_s2 + $0x18] sm:$0xff] (!%p185_p3)   ;;  %v750_v20 = vld [vmem:[%s883_s2 + $0x20] sm:$0xff] (!%p185_p3)   ;;  %vm549_vm3 = vcmask (!%p185_p3), 23552  }
   0x9   : > { %742 = vset.pattern.permute.xlu1 (!%p185_p3), %v779_v10  ;;  %743 = vset.pattern.permute.xlu0 (!%p185_p3), %v779_v10 }
   0xe   : > { %s891_s15 = smov (!%p216_p4, %s765_s15), 1 }
   0xf   : > { %s646_s19 = sshll.u32 %s891_s15, 2  ;;  %s672_s20 = sshll.u32 %s891_s15, 4 }
  0x10   : > { %s219_s22 = scalar_lea.vmem %s881_s0, %s646_s19  ;;  %s223_s25 = scalar_lea.vmem %s882_s1, %s646_s19 }
  0x11   : > { %v233_v1 = vld [vmem:[%s219_s22] sm:$0xf]  ;;  %s231_s23 = scalar_lea.vmem %s885_s4, %s672_s20 }
  0x12   : > { %v236_v2 = vld [vmem:[%s223_s25] sm:$0xf]  ;;  %v659_v3 = vcombine.low %v233_v1, %v233_v1  ;;  %v303_v6 = vsel %vm249_vm1, %v233_v1, 0 }
  0x13   : > { %v251_v4 = vsel %vm249_vm1, %v236_v2, 0  ;;  %690 = vmatpush3.bf16.msra.mxu1 %v303_v6  ;;  %v664_v8 = vcombine.low %v236_v2, %v236_v2 }
  0x14   : > { %684 = vmatpush3.bf16.msra.mxu0 %v251_v4  ;;  %357 = vrot.lane.b32.xlu0 %v659_v3, %s777_s30 }
  0x15   : > { %478 = vrot.lane.b32.xlu1 %v659_v3, %s778_s5  ;;  %695 = vmatprep.subr.bf16.mxu0 %v775_v0 }
  0x16   : > { %701 = vmatprep.subr.bf16.mxu1 %v775_v0  ;;  %692 = vmatmul.mubr.msk.bf16.vlgmr.msra.gmra.mrb[0].mxu1 %vm245_vm2, %v747_v7 }
  0x17   : > { %686 = vmatmul.mubr.msk.bf16.vlgmr.msra.gmra.mrb[0].mxu0 %vm245_vm2, %v746_v5  ;;  %703 = vmatprep.mubr.msk.bf16.mxu1 %vm776_vm0, %v775_v0 }
  0x18   : > { %697 = vmatprep.mubr.msk.bf16.mxu0 %vm776_vm0, %v775_v0  ;;  %419 = vrot.lane.b32.xlu0 %v664_v8, %s777_s30 }
  0x19   : > { %533 = vperm.xlu1 %742, %v529_v9  }
  0x1c   : > { %538 = vperm.xlu0 %743, %v530_v11  }
  0x86   : > { %v358_v12 = vpop.permute.xlu0 %357 }
  0x87   : > { %v479_v13 = vpop.permute.xlu1 %478  ;;  %v363_v14 = vsel %vm249_vm1, %v358_v12, 0 }
  0x88   : > { %696 = vmatpush3.bf16.msra.mxu0 %v363_v14  ;;  %v484_v16 = vsel %vm249_vm1, %v479_v13, 0 }
  0x89   : > { %707 = vmatprep.subr.bf16.mxu0 %v775_v0 }
  0x8a   : > { %v420_v17 = vpop.permute.xlu0 %419 }
  0x8b   : > { %v425_v18 = vsel %vm249_vm1, %v420_v17, 0  ;;  %698 = vmatmul.mubr.msk.bf16.vlgmr.msra.gmra.mrb[4].mxu0 %vm245_vm2, %v748_v15 }
  0x8c   : > { %702 = vmatpush3.bf16.msra.mxu1 %v425_v18  ;;  %708 = vmatpush3.bf16.msra.mxu0 %v484_v16 }
  0x8d   : > { %709 = vmatprep.mubr.msk.bf16.mxu0 %vm776_vm0, %v775_v0 }
  0x8f   : > { %704 = vmatmul.mubr.msk.bf16.vlgmr.msra.gmra.mrb[4].mxu1 %vm245_vm2, %v749_v19 }
  0x93   : > { %710 = vmatmul.mubr.msk.bf16.vlgmr.msra.gmra.mrb[8].mxu0 %vm245_vm2, %v750_v20 }
  0x98   : > { %v534_v44 = vpop.permute.xlu1 %533 }
  0x9b   : > { %v539_v48 = vpop.permute.xlu0 %538 }
  0xe9   : > { %v339_v22 = vpop.f32.mrb[0].mxu1 }
  0xea   : > { %v287_v21 = vpop.f32.mrb[0].mxu0  ;;  %v693_v25 = vpop.f32.mrb[1].mxu1 }
  0xeb   : > { %v687_v23 = vpop.f32.mrb[1].mxu0  ;;  %v340_v24 = vadd.f32 %v339_v22, %v287_v21  ;;  %v342_v27 = vpop.f32.mrb[2].mxu1 }
  0xec   : > { %v290_v26 = vpop.f32.mrb[2].mxu0  ;;  %v694_v30 = vpop.f32.mrb[3].mxu1 }
  0xed   : > { %v688_v28 = vpop.f32.mrb[3].mxu0  ;;  %v343_v29 = vadd.f32 %v342_v27, %v290_v26 }
 0x15e   : > { %v399_v31 = vpop.f32.mrb[4].mxu0 }
 0x15f   : > { %v406_v32 = vadd.f32 %v399_v31, %v340_v24  ;;  %v699_v33 = vpop.f32.mrb[5].mxu0 }
 0x160   : > { %v402_v34 = vpop.f32.mrb[6].mxu0 }
 0x161   : > { %v407_v35 = vadd.f32 %v402_v34, %v343_v29  ;;  %v700_v36 = vpop.f32.mrb[7].mxu0 }
 0x162   : > { %v461_v37 = vpop.f32.mrb[4].mxu1 }
 0x163   : > { %v468_v38 = vadd.f32 %v461_v37, %v406_v32  ;;  %v705_v39 = vpop.f32.mrb[5].mxu1 }
 0x164   : > { %v464_v40 = vpop.f32.mrb[6].mxu1 }
 0x165   : > { %v469_v41 = vadd.f32 %v464_v40, %v407_v35  ;;  %v706_v42 = vpop.f32.mrb[7].mxu1 }
 0x166   : > { %v520_v43 = vpop.f32.mrb[8].mxu0 }
 0x167   : > { %v527_v45 = vadd.f32 %v520_v43, %v468_v38  ;;  %v711_v46 = vpop.f32.mrb[9].mxu0 }
 0x168   : > { %v523_v47 = vpop.f32.mrb[10].mxu0 }
 0x169   : > { %v541_v49 = vadd.f32 %v534_v44, %v527_v45  ;;  %v528_v50 = vadd.f32 %v523_v47, %v469_v41  ;;  %v712_v51 = vpop.f32.mrb[11].mxu0 }
 0x16b   : > { %vm543_vm4 = vcmp.ge.f32.partialorder %v541_v49, 0.0  ;;  %v545_v52 = vmul.f32 0.2, %v541_v49  ;;  %v542_v53 = vadd.f32 %v539_v48, %v528_v50 }
 0x16d   : > { %v547_v54 = vsel %vm543_vm4, %v541_v49, %v545_v52  ;;  %vm544_vm5 = vcmp.ge.f32.partialorder %v542_v53, 0.0  ;;  %v546_v55 = vmul.f32 0.2, %v542_v53 }
 0x16e   : > { %550 = vst.msk [vmem:[%s231_s23] sm:$0xff] %vm549_vm3, %v547_v54 }
 0x16f   : > { %v548_v56 = vsel %vm544_vm5, %v542_v53, %v546_v55 }
 0x170   : > { %551 = vst.msk [vmem:[%s231_s23 + $0x8] sm:$0xff] %vm549_vm3, %v548_v56 }
 0x171 PF: > { %s14_s17 = sadd.s32 1, %s773_s17   ;;  %s886_s15 = smov %s769_s16 }
 0x172   : > { %p11_p5 = scmp.ge.s32.totalorder %s14_s17, 4   ;;  %s887_s16 = smov %s889_s18 }
 0x174   :  { %13 = sbr.rel (!%p11_p5) target bundleno = 2 (0x2), region = 73 }

</bundles_post_ra>
